<compile_context>
chip_gen: v7x
topology: tpu7x:2x2x1
jax: 0.10.0
libtpu: 0.0.40
codegen_flags: <defaults>
</compile_context>

<pallas_src>
import functools

import jax
import jax.numpy as jnp
from jax import lax
from jax.experimental import pallas as pl
from jax.experimental.pallas import tpu as pltpu

LANES = 128
MAX_TILE_ROWS = 2048                 # rows per grid step (multiple of 8)
INPUT_VMEM_BUDGET = 8 * 1024 * 1024  # bytes for double-buffered input blocks
CLAMP = 100.0                        # PyTorch BCELoss clamps log at -100


def _round_up(x, m):
    return -(-x // m) * m


def _num_tensorcores():
    """Best-effort TensorCores-per-device (v7x: 2). Safe fallback: 1."""
    try:
        info = pltpu.get_tpu_info()
    except Exception:
        return 1
    for name in ("num_tensorcores", "tensorcores_per_chip", "num_cores",
                 "core_count", "cores_per_chip"):
        val = getattr(info, name, None)
        if isinstance(val, int) and val >= 1:
            return val
    return 1


def _make_kernel(batch, tile_rows, n_inner, n_pos, n_neg):
    groups = tile_rows // 8

    def kernel(s_ref, n_ref, acc_ref):
        core = pl.program_id(0)
        step = pl.program_id(1)

        @pl.when(step == 0)
        def _():
            acc_ref[...] = jnp.zeros_like(acc_ref)

        # Raw (unclamped) block id; may run past n_blocks on the padded core
        # split, in which case rows_left <= 0 and the mask zeroes everything.
        blk = core * n_inner + step
        rows_left = batch - blk * tile_rows
        row_ids = lax.broadcasted_iota(jnp.int32, (tile_rows, 1), 0)
        valid = row_ids < rows_left                       # (tile_rows, 1)

        s = s_ref[...].astype(jnp.float32)                # (tile_rows, n_pos)
        n = n_ref[...].astype(jnp.float32)                # (tile_rows, n_neg)

        # -log(sigmoid(s)) = softplus(-s);  -log(1 - sigmoid(n)) = softplus(n)
        # Stable softplus: relu(x) + log1p(exp(-|x|))  -> exactly 2 EUP ops.
        t_pos = jnp.minimum(jax.nn.relu(-s) + jnp.log1p(jnp.exp(-jnp.abs(s))), CLAMP)
        t_neg = jnp.minimum(jax.nn.relu(n) + jnp.log1p(jnp.exp(-jnp.abs(n))), CLAMP)
        t_pos = jnp.where(valid, t_pos, 0.0)
        t_neg = jnp.where(valid, t_neg, 0.0)

        # Sublane reduction as whole-vreg VPU adds (no XLU): (tile, L) -> (8, L).
        acc_ref[:, :n_pos] += t_pos.reshape(groups, 8, n_pos).sum(axis=0)
        acc_ref[:, :n_neg] += t_neg.reshape(groups, 8, n_neg).sum(axis=0)

    return kernel


@functools.partial(jax.jit, static_argnames=("embedding_reg",))
def nce_loss(scores, noise_scores, embed_norm, embedding_reg=0.0):
    """Pallas implementation of NoiseContrastiveLoss.forward."""
    assert scores.ndim == 2 and noise_scores.ndim == 2
    assert scores.shape[0] == noise_scores.shape[0]
    batch, n_pos = scores.shape
    _, n_neg = noise_scores.shape
    total = batch * (n_pos + n_neg)

    # Row tile: as big as reasonable, multiple of 8, never larger than the
    # (8-rounded) batch, capped so the double-buffered input blocks stay small
    # even for large n_pos/n_neg.
    bytes_per_row = (_round_up(n_pos, LANES) * scores.dtype.itemsize
                     + _round_up(n_neg, LANES) * noise_scores.dtype.itemsize)
    vmem_cap_rows = max(8, (INPUT_VMEM_BUDGET // (2 * bytes_per_row)) // 8 * 8)
    tile_rows = min(MAX_TILE_ROWS, vmem_cap_rows, _round_up(batch, 8))

    n_blocks = pl.cdiv(batch, tile_rows)
    num_cores = max(1, min(_num_tensorcores(), n_blocks, 2))
    n_inner = pl.cdiv(n_blocks, num_cores)
    acc_lanes = _round_up(max(n_pos, n_neg, LANES), LANES)

    kernel = _make_kernel(batch, tile_rows, n_inner, n_pos, n_neg)

    def in_map(c, i):
        # Clamp so the padded tail of the core split never indexes OOB; the
        # in-kernel mask (computed from the raw block id) zeroes those blocks.
        return (jnp.minimum(c * n_inner + i, n_blocks - 1), 0)

    lead_sem = pltpu.CORE_PARALLEL if num_cores > 1 else pltpu.ARBITRARY

    cost = pl.CostEstimate(
        flops=8 * total,
        transcendentals=2 * total,
        bytes_accessed=scores.size * scores.dtype.itemsize
        + noise_scores.size * noise_scores.dtype.itemsize
        + num_cores * 8 * acc_lanes * 4,
    )

    partials = pl.pallas_call(
        kernel,
        out_shape=jax.ShapeDtypeStruct((num_cores * 8, acc_lanes), jnp.float32),
        grid_spec=pltpu.PrefetchScalarGridSpec(
            num_scalar_prefetch=0,
            grid=(num_cores, n_inner),
            in_specs=[
                pl.BlockSpec((tile_rows, n_pos), in_map),
                pl.BlockSpec((tile_rows, n_neg), in_map),
            ],
            out_specs=pl.BlockSpec((8, acc_lanes), lambda c, i: (c, 0)),
        ),
        compiler_params=pltpu.CompilerParams(
            dimension_semantics=(lead_sem, pltpu.ARBITRARY)),
        cost_estimate=cost,
    )(scores, noise_scores)

    bce = jnp.sum(partials) / jnp.float32(total)
    return bce + jnp.float32(embedding_reg) * embed_norm.astype(jnp.float32)


def _reference(scores, noise_scores, embed_norm, embedding_reg):
    # Pure-JAX reference mirroring the PyTorch module exactly.
    pred = jax.nn.sigmoid(
        jnp.concatenate([scores, noise_scores], axis=1).astype(jnp.float32))
    labels = jnp.concatenate(
        [jnp.ones(scores.shape, jnp.float32),
         jnp.zeros(noise_scores.shape, jnp.float32)], axis=1)
    log_p = jnp.maximum(jnp.log(pred), -100.0)
    log_1mp = jnp.maximum(jnp.log(1.0 - pred), -100.0)
    bce = -jnp.mean(labels * log_p + (1.0 - labels) * log_1mp)
    return bce + embedding_reg * embed_norm


if __name__ == "__main__":
    key = jax.random.PRNGKey(0)
    k1, k2, k3 = jax.random.split(key, 3)

    B, P, K = 8, 4, 16                        # batch, positives, noise samples
    scores = jax.random.normal(k1, (B, P), dtype=jnp.float32)
    noise_scores = jax.random.normal(k2, (B, K), dtype=jnp.float32)
    embed_norm = jnp.abs(jax.random.normal(k3, (), dtype=jnp.float32))
    embedding_reg = 0.01

    loss = nce_loss(scores, noise_scores, embed_norm, embedding_reg)
    loss = jax.block_until_ready(loss)

    ref = _reference(scores, noise_scores, embed_norm, embedding_reg)
    assert jnp.allclose(loss, ref, rtol=1e-5, atol=1e-5), (loss, ref)

    print("KERNEL_OK")
</pallas_src>

<mosaic_0001>
module attributes {stable_mosaic.version = 11 : i64} {
  func.func @kernel(%arg0: i32, %arg1: i32, %arg2: memref<8x4xf32, #tpu.memory_space<vmem>>, %arg3: memref<8x16xf32, #tpu.memory_space<vmem>>, %arg4: memref<8x128xf32, #tpu.memory_space<vmem>>) attributes {dimension_semantics = [#tpu.dimension_semantics<arbitrary>, #tpu.dimension_semantics<arbitrary>], iteration_bounds = array<i64: 1, 1>, scalar_prefetch = 0 : i64, scratch_operands = 0 : i64, tpu.core_type = #tpu.core_type<tc>, window_params = [{transform_indices = @transform_0, window_bounds = array<i64: 8, 4>}, {transform_indices = @transform_1, window_bounds = array<i64: 8, 16>}, {transform_indices = @transform_2, window_bounds = array<i64: 8, 128>}]} {
    %c0_i32 = arith.constant 0 : i32
    %0 = arith.cmpi eq, %arg1, %c0_i32 : i32
    %1 = arith.extui %0 : i1 to i32
    %c0_i32_0 = arith.constant 0 : i32
    %2 = arith.cmpi ne, %1, %c0_i32_0 : i32
    scf.if %2 {
      %cst_23 = arith.constant 0.000000e+00 : f32
      %52 = vector.broadcast %cst_23 : f32 to vector<8x128xf32>
      %c0_24 = arith.constant 0 : index
      %c0_25 = arith.constant 0 : index
      %53 = vector.load %arg4[%c0_24, %c0_25] : memref<8x128xf32, #tpu.memory_space<vmem>>, vector<8x128xf32>
      tpu.vector_store %arg4[%c0_24, %c0_25], %52 {strides = array<i32>} : memref<8x128xf32, #tpu.memory_space<vmem>>, vector<8x128xf32>,
    } else {
    }
    %c1_i32 = arith.constant 1 : i32
    %3 = arith.muli %arg0, %c1_i32 : i32
    %4 = arith.addi %3, %arg1 : i32
    %c8_i32 = arith.constant 8 : i32
    %5 = arith.muli %4, %c8_i32 : i32
    %c8_i32_1 = arith.constant 8 : i32
    %6 = arith.subi %c8_i32_1, %5 : i32
    %7 = tpu.iota {dimensions = array<i32: 0>} : vector<8x1xi32>
    %8 = vector.broadcast %6 : i32 to vector<8x1xi32>
    %9 = arith.cmpi slt, %7, %8 : vector<8x1xi32>
    %c0 = arith.constant 0 : index
    %c0_2 = arith.constant 0 : index
    %10 = vector.load %arg2[%c0, %c0_2] : memref<8x4xf32, #tpu.memory_space<vmem>>, vector<8x4xf32>
    %c0_3 = arith.constant 0 : index
    %c0_4 = arith.constant 0 : index
    %11 = vector.load %arg3[%c0_3, %c0_4] : memref<8x16xf32, #tpu.memory_space<vmem>>, vector<8x16xf32>
    %cst = arith.constant 0.000000e+00 : f32
    %12 = vector.broadcast %cst : f32 to vector<8x4xf32>
    %13 = arith.subf %12, %10 : vector<8x4xf32>
    %cst_5 = arith.constant 0.000000e+00 : f32
    %14 = vector.broadcast %cst_5 : f32 to vector<8x4xf32>
    %15 = arith.maximumf %13, %14 : vector<8x4xf32>
    %16 = math.absf %10 : vector<8x4xf32>
    %cst_6 = arith.constant 0.000000e+00 : f32
    %17 = vector.broadcast %cst_6 : f32 to vector<8x4xf32>
    %18 = arith.subf %17, %16 : vector<8x4xf32>
    %19 = math.exp %18 : vector<8x4xf32>
    %20 = math.log1p %19 : vector<8x4xf32>
    %21 = arith.addf %15, %20 : vector<8x4xf32>
    %cst_7 = arith.constant 1.000000e+02 : f32
    %22 = vector.broadcast %cst_7 : f32 to vector<8x4xf32>
    %23 = arith.minimumf %21, %22 : vector<8x4xf32>
    %cst_8 = arith.constant 0.000000e+00 : f32
    %24 = vector.broadcast %cst_8 : f32 to vector<8x16xf32>
    %25 = arith.maximumf %11, %24 : vector<8x16xf32>
    %26 = math.absf %11 : vector<8x16xf32>
    %cst_9 = arith.constant 0.000000e+00 : f32
    %27 = vector.broadcast %cst_9 : f32 to vector<8x16xf32>
    %28 = arith.subf %27, %26 : vector<8x16xf32>
    %29 = math.exp %28 : vector<8x16xf32>
    %30 = math.log1p %29 : vector<8x16xf32>
    %31 = arith.addf %25, %30 : vector<8x16xf32>
    %cst_10 = arith.constant 1.000000e+02 : f32
    %32 = vector.broadcast %cst_10 : f32 to vector<8x16xf32>
    %33 = arith.minimumf %31, %32 : vector<8x16xf32>
    %cst_11 = arith.constant 0.000000e+00 : f32
    %34 = vector.shape_cast %9 : vector<8x1xi1> to vector<8x1xi1>
    %35 = vector.broadcast %34 : vector<8x1xi1> to vector<8x4xi1>
    %36 = vector.broadcast %cst_11 : f32 to vector<8x4xf32>
    %37 = arith.select %35, %23, %36 : vector<8x4xi1>, vector<8x4xf32>
    %cst_12 = arith.constant 0.000000e+00 : f32
    %38 = vector.shape_cast %9 : vector<8x1xi1> to vector<8x1xi1>
    %39 = vector.broadcast %38 : vector<8x1xi1> to vector<8x16xi1>
    %40 = vector.broadcast %cst_12 : f32 to vector<8x16xf32>
    %41 = arith.select %39, %33, %40 : vector<8x16xi1>, vector<8x16xf32>
    %c0_13 = arith.constant 0 : index
    %c0_14 = arith.constant 0 : index
    %42 = vector.load %arg4[%c0_13, %c0_14] : memref<8x128xf32, #tpu.memory_space<vmem>>, vector<8x4xf32>
    %43 = vector.shape_cast %37 : vector<8x4xf32> to vector<1x8x4xf32>
    %cst_15 = arith.constant dense<0.000000e+00> : vector<8x4xf32>
    %44 = vector.multi_reduction <add>, %43, %cst_15 [0] : vector<1x8x4xf32> to vector<8x4xf32>
    %45 = arith.addf %42, %44 : vector<8x4xf32>
    %c0_16 = arith.constant 0 : index
    %c0_17 = arith.constant 0 : index
    %46 = vector.load %arg4[%c0_16, %c0_17] : memref<8x128xf32, #tpu.memory_space<vmem>>, vector<8x4xf32>
    tpu.vector_store %arg4[%c0_16, %c0_17], %45 {strides = array<i32>} : memref<8x128xf32, #tpu.memory_space<vmem>>, vector<8x4xf32>,
    %c0_18 = arith.constant 0 : index
    %c0_19 = arith.constant 0 : index
    %47 = vector.load %arg4[%c0_18, %c0_19] : memref<8x128xf32, #tpu.memory_space<vmem>>, vector<8x16xf32>
    %48 = vector.shape_cast %41 : vector<8x16xf32> to vector<1x8x16xf32>
    %cst_20 = arith.constant dense<0.000000e+00> : vector<8x16xf32>
    %49 = vector.multi_reduction <add>, %48, %cst_20 [0] : vector<1x8x16xf32> to vector<8x16xf32>
    %50 = arith.addf %47, %49 : vector<8x16xf32>
    %c0_21 = arith.constant 0 : index
    %c0_22 = arith.constant 0 : index
    %51 = vector.load %arg4[%c0_21, %c0_22] : memref<8x128xf32, #tpu.memory_space<vmem>>, vector<8x16xf32>
    tpu.vector_store %arg4[%c0_21, %c0_22], %50 {strides = array<i32>} : memref<8x128xf32, #tpu.memory_space<vmem>>, vector<8x16xf32>,
    return
  }
  func.func @transform_0(%arg0: i32, %arg1: i32) -> (i32, i32) {
    %c1_i32 = arith.constant 1 : i32
    %0 = arith.muli %arg0, %c1_i32 : i32
    %1 = arith.addi %0, %arg1 : i32
    %c0_i32 = arith.constant 0 : i32
    %2 = arith.minsi %1, %c0_i32 : i32
    %c0_i32_0 = arith.constant 0 : i32
    %c0_i32_1 = arith.constant 0 : i32
    return %2, %c0_i32_0 : i32, i32
  }
  func.func @transform_1(%arg0: i32, %arg1: i32) -> (i32, i32) {
    %c1_i32 = arith.constant 1 : i32
    %0 = arith.muli %arg0, %c1_i32 : i32
    %1 = arith.addi %0, %arg1 : i32
    %c0_i32 = arith.constant 0 : i32
    %2 = arith.minsi %1, %c0_i32 : i32
    %c0_i32_0 = arith.constant 0 : i32
    %c0_i32_1 = arith.constant 0 : i32
    return %2, %c0_i32_0 : i32, i32
  }
  func.func @transform_2(%arg0: i32, %arg1: i32) -> (i32, i32) {
    %c0_i32 = arith.constant 0 : i32
    %c0_i32_0 = arith.constant 0 : i32
    return %arg0, %c0_i32 : i32, i32
  }
}

</mosaic_0001>

<bundles_post_ra>
// kernel: nce_loss.1
= control target key start
LH: loop header
LB: loop body
LE: loop exit
PB: predicated region body
PF: predicated region fallthrough
CT: control target
= control target key end

     0   :  { %v151_v0 = vmov 0.0   ;;  %vm119_vm2 = vcmask 31744   ;;  %vm124_vm3 = vcmask 130048   ;;  %s185_s2 = inlined_call_operand.vmem [shape: f32[8,128], index: 2, kind: output, shape index: {}]   ;;  %s186_s0 = inlined_call_operand.vmem [shape: f32[8,4], index: 0, kind: input, shape index: {}]   ;;  %s187_s1 = inlined_call_operand.vmem [shape: f32[8,16], index: 1, kind: input, shape index: {}]  }
   0x1   :  { %69 = vst [vmem:[%s185_s2] sm:$0xff] %v151_v0  ;;  %v77_v1 = vld [vmem:[%s186_s0] sm:$0xff] }
   0x2   :  { %v78_v2 = vld [vmem:[%s187_s1] sm:$0xff]  ;;  %v81_v3 = vand.u32 2147483647, %v77_v1  ;;  %v79_v16 = vsub.f32 0.0, %v77_v1 }
   0x3   :  { %v97_v4 = vand.u32 2147483647, %v78_v2  ;;  %v96_v30 = vmax.f32 %v78_v2, 0.0 }
   0x4   :  { %v82_v5 = vsub.f32 0.0, %v81_v3  ;;  %v80_v21 = vmax.f32 %v79_v16, 0.0 }
   0x5   :  { %v98_v6 = vsub.f32 0.0, %v97_v4 }
   0x6   :  { %v83_v7 = vmul.f32 1.442695, %v82_v5 }
   0x7   :  { %v99_v8 = vmul.f32 1.442695, %v98_v6 }
   0x8   :  { %143 = vpow2.f32 %v83_v7 }
   0x9   :  { %145 = vpow2.f32 %v99_v8 }
  0x12   :  { %v144_v9 = vpop.eup %143 }
  0x13   :  { %v146_v10 = vpop.eup %145  ;;  %v85_v11 = vadd.f32 1.0, %v144_v9  ;;  %v88_v13 = vmul.f32 -0.5, %v144_v9  ;;  %v91_v17 = vand.u32 2147483647, %v144_v9 }
  0x14   :  { %v101_v12 = vadd.f32 1.0, %v146_v10  ;;  %v104_v15 = vmul.f32 -0.5, %v146_v10  ;;  %v107_v22 = vand.u32 2147483647, %v146_v10 }
  0x15   :  { %147 = vlog2.f32 %v85_v11  ;;  %v89_v14 = vadd.f32 1.0, %v88_v13  ;;  %vm92_vm0 = vcmp.lt.f32.partialorder %v91_v17, 0.0004427343 }
  0x16   :  { %149 = vlog2.f32 %v101_v12  ;;  %v105_v19 = vadd.f32 1.0, %v104_v15  ;;  %vm108_vm1 = vcmp.lt.f32.partialorder %v107_v22, 0.0004427343 }
  0x17   :  { %v90_v18 = vmul.f32 %v144_v9, %v89_v14 }
  0x18   :  { %v106_v27 = vmul.f32 %v146_v10, %v105_v19 }
  0x1f   :  { %v148_v20 = vpop.eup %147 }
  0x20   :  { %v150_v23 = vpop.eup %149  ;;  %v87_v24 = vmul.f32 0.6931472, %v148_v20 }
  0x21   :  { %v103_v26 = vmul.f32 0.6931472, %v150_v23 }
  0x22   :  { %v93_v25 = vsel %vm92_vm0, %v90_v18, %v87_v24 }
  0x23   :  { %v94_v28 = vadd.f32 %v93_v25, %v80_v21  ;;  %v109_v31 = vsel %vm108_vm1, %v106_v27, %v103_v26 }
  0x24   :  { %v110_v32 = vadd.f32 %v109_v31, %v96_v30 }
  0x25   :  { %v95_v29 = vmin.f32 %v94_v28, 100.0 }
  0x26   :  { %v111_v33 = vmin.f32 %v110_v32, 100.0 }
  0x27   :  { %120 = vst.msk [vmem:[%s185_s2] sm:$0xff] %vm119_vm2, %v95_v29 }
  0x2e   :  { %v121_v34 = vld [vmem:[%s185_s2] sm:$0xff] }
  0x2f   :  { %v123_v35 = vadd.f32 %v121_v34, %v111_v33 }
  0x31   :  { %125 = vst.msk [vmem:[%s185_s2] sm:$0xff] %vm124_vm3, %v123_v35 }

</bundles_post_ra>
